<compile_context>
chip_gen: v7x
topology: tpu7x:2x2x1
jax: 0.10.0
libtpu: 0.0.40
codegen_flags: <defaults>
</compile_context>

<pallas_src>
import jax
import jax.numpy as jnp
import numpy as np
from jax import lax
from jax.experimental import pallas as pl
from jax.experimental.pallas import tpu as pltpu


TILE_M = 4096  # lane-dim tile of the flattened-pixel axis (multiple of 128)  [R4]


def _round_up(x, m):
    return ((x + m - 1) // m) * m


# ----------------------------------------------------------------------------
# Pallas kernel: out = relu(W2d @ cols + bias), tiled over M (lane dim).
# ----------------------------------------------------------------------------
def _gemm_bias_relu_kernel(w_ref, cols_ref, b_ref, o_ref):
    # (Cout, K) @ (K, TM) on the MXU, f32 accumulation.
    acc = jnp.dot(w_ref[...], cols_ref[...], preferred_element_type=jnp.float32)
    acc = acc + b_ref[...]                       # (Cout, 1) f32 broadcasts over lanes
    o_ref[...] = jnp.maximum(acc, 0.0).astype(o_ref.dtype)       # [R10] f32 epilogue


def _gemm_bias_relu(w2d, cols, b2d, out_dtype):
    """relu(w2d @ cols + b2d); w2d: (Cout, K) bf16, cols: (K, M) bf16, b2d: (Cout, 1) f32.

    M is guaranteed (by the glue) to be a multiple of 128, so every output tile is
    lane-dense.
    """
    cout, k = w2d.shape
    _, m = cols.shape

    if m <= 128:
        tm = m
    else:
        # [R5] cap the tile so the grid has >= 2 steps -> v7x megacore shards M.
        tm = min(TILE_M, _round_up(-(-m // 2), 128))
    grid = (pl.cdiv(m, tm),)

    out_itemsize = jnp.dtype(out_dtype).itemsize
    cost = pl.CostEstimate(
        flops=2 * m * k * cout,
        transcendentals=0,
        bytes_accessed=(m * k * cols.dtype.itemsize
                        + cout * k * w2d.dtype.itemsize
                        + cout * 4
                        + cout * m * out_itemsize),
    )

    return pl.pallas_call(
        _gemm_bias_relu_kernel,
        out_shape=jax.ShapeDtypeStruct((cout, m), out_dtype),
        grid=grid,
        in_specs=[
            pl.BlockSpec((cout, k), lambda i: (0, 0)),   # weights: resident across M
            pl.BlockSpec((k, tm), lambda i: (0, i)),     # cols tile: pipelined over M
            pl.BlockSpec((cout, 1), lambda i: (0, 0)),   # bias: resident
        ],
        out_specs=pl.BlockSpec((cout, tm), lambda i: (0, i)),
        compiler_params=pltpu.CompilerParams(
            dimension_semantics=("parallel",),           # shard M across TCs (v7x)
        ),
        cost_estimate=cost,
    )(w2d, cols, b2d)


# ----------------------------------------------------------------------------
# Glue: replicate padding + channel-major im2col (pure data movement, no FLOPs).
# ----------------------------------------------------------------------------
def _im2col_cmajor(xp_cm, kh, kw, stride, oh, ow):
    """(C, N, Hp, Wp) padded channel-major input -> (KH*KW*C, N*OH*OW).

    K order = (ki, kj, c); no transpose is needed because the input is already
    channel-major.  [R2]
    """
    c, n = xp_cm.shape[0], xp_cm.shape[1]
    taps = []
    for ki in range(kh):
        for kj in range(kw):
            taps.append(
                xp_cm[:, :, ki: ki + stride * oh: stride,
                            kj: kj + stride * ow: stride]
            )
    cols = jnp.stack(taps, axis=0)                  # (T, C, N, OH, OW)
    return cols.reshape(kh * kw * c, n * oh * ow)   # (K, M)


def _conv_relu_cmajor(x_cm, w_oihw, b, stride, pad, out_dtype):
    """Channel-major conv + ReLU: (Cin, N, H, W) bf16 -> (Cout, N, OH, OW) out_dtype."""
    cout, cin, kh, kw = w_oihw.shape
    _, n, h, w = x_cm.shape

    # PyTorch padding_mode='replicate' == jnp.pad mode='edge'.
    xp = jnp.pad(x_cm, ((0, 0), (0, 0), (pad, pad), (pad, pad)), mode="edge")
    hp, wp = h + 2 * pad, w + 2 * pad
    oh = (hp - kh) // stride + 1
    ow = (wp - kw) // stride + 1
    m = n * oh * ow

    cols = _im2col_cmajor(xp, kh, kw, stride, oh, ow)            # (K, M) bf16  [R3]
    m_pad = _round_up(m, 128)                                    # [R7] lane-dense M
    if m_pad != m:
        cols = jnp.pad(cols, ((0, 0), (0, m_pad - m)))

    # (Cout, Cin, KH, KW) -> (Cout, KH, KW, Cin) -> (Cout, K); matches cols K order.
    w2d = jnp.transpose(w_oihw, (0, 2, 3, 1)).reshape(cout, kh * kw * cin)
    w2d = w2d.astype(jnp.bfloat16)
    b2d = b.reshape(cout, 1).astype(jnp.float32)

    out = _gemm_bias_relu(w2d, cols, b2d, out_dtype)             # (Cout, m_pad)
    # Drop M padding; stay channel-major for the next layer (no NCHW round trip). [R2]
    return out[:, :m].reshape(cout, n, oh, ow)


# ----------------------------------------------------------------------------
# DQNImageBlock forward: conv(8,s4,p3)+ReLU -> conv(4,s2,p2)+ReLU
#                        -> conv(3,s1,p1)+ReLU.  NCHW in, NCHW out.
# ----------------------------------------------------------------------------
def dqn_image_block(x_nchw, params):
    # Single NCHW -> channel-major transpose + bf16 cast up front.  [R2][R3]
    x = jnp.transpose(x_nchw.astype(jnp.bfloat16), (1, 0, 2, 3))   # (C, N, H, W)
    x = _conv_relu_cmajor(x, params["w1"], params["b1"], stride=4, pad=3,
                          out_dtype=jnp.bfloat16)   # bf16 inter-layer activations
    x = _conv_relu_cmajor(x, params["w2"], params["b2"], stride=2, pad=2,
                          out_dtype=jnp.bfloat16)
    x = _conv_relu_cmajor(x, params["w3"], params["b3"], stride=1, pad=1,
                          out_dtype=jnp.float32)    # final layer back to f32
    # Single channel-major -> NCHW transpose at the very end.  [R2]
    return jnp.transpose(x, (1, 0, 2, 3))


def init_params(key, in_ch, filters=32):
    def conv_init(k, cout, cin, kh, kw):
        kw_, kb_ = jax.random.split(k)
        fan_in = cin * kh * kw
        bound = 1.0 / np.sqrt(fan_in)                    # PyTorch Conv2d default bound
        w = jax.random.uniform(kw_, (cout, cin, kh, kw), jnp.float32, -bound, bound)
        b = jax.random.uniform(kb_, (cout,), jnp.float32, -bound, bound)
        return w, b

    k1, k2, k3 = jax.random.split(key, 3)
    w1, b1 = conv_init(k1, filters, in_ch, 8, 8)
    w2, b2 = conv_init(k2, filters * 2, filters, 4, 4)
    w3, b3 = conv_init(k3, filters * 2, filters * 2, 3, 3)
    return dict(w1=w1, b1=b1, w2=w2, b2=b2, w3=w3, b3=b3)


# ----------------------------------------------------------------------------
# Pure-JAX f32 reference (lax conv on edge-padded input) for correctness check.
# ----------------------------------------------------------------------------
def _ref_conv_relu(x_nchw, w, b, stride, pad):
    xp = jnp.pad(x_nchw, ((0, 0), (0, 0), (pad, pad), (pad, pad)), mode="edge")
    y = lax.conv_general_dilated(
        xp, w, window_strides=(stride, stride), padding="VALID",
        dimension_numbers=("NCHW", "OIHW", "NCHW"))
    return jnp.maximum(y + b[None, :, None, None], 0.0)


def dqn_image_block_ref(x_nchw, params):
    x = _ref_conv_relu(x_nchw, params["w1"], params["b1"], 4, 3)
    x = _ref_conv_relu(x, params["w2"], params["b2"], 2, 2)
    x = _ref_conv_relu(x, params["w3"], params["b3"], 1, 1)
    return x


if __name__ == "__main__":
    key = jax.random.PRNGKey(0)
    k_x, k_p = jax.random.split(key)

    # Small shapes: batch=2, in_shape=(4, 16, 16) -> output (2, 64, 3, 3)
    B, C, H, W = 2, 4, 16, 16
    x = jax.random.normal(k_x, (B, C, H, W), jnp.float32)
    params = init_params(k_p, in_ch=C, filters=32)

    out = jax.block_until_ready(jax.jit(dqn_image_block)(x, params))
    ref = jax.block_until_ready(dqn_image_block_ref(x, params))

    assert out.shape == (B, 64, 3, 3), out.shape
    # bf16 MXU operands + bf16 intermediates -> loosened tolerance vs the f32 reference.
    np.testing.assert_allclose(np.asarray(out, dtype=np.float32), np.asarray(ref),
                               rtol=5e-2, atol=5e-2)

    print("KERNEL_OK")
</pallas_src>

<mosaic_0001>
module attributes {stable_mosaic.version = 11 : i64} {
  func.func @_gemm_bias_relu_kernel(%arg0: i32, %arg1: memref<32x256xbf16, #tpu.memory_space<vmem>>, %arg2: memref<256x128xbf16, #tpu.memory_space<vmem>>, %arg3: memref<32x1xf32, #tpu.memory_space<vmem>>, %arg4: memref<32x128xbf16, #tpu.memory_space<vmem>>) attributes {dimension_semantics = [#tpu.dimension_semantics<parallel>], iteration_bounds = array<i64: 1>, scalar_prefetch = 0 : i64, scratch_operands = 0 : i64, tpu.core_type = #tpu.core_type<tc>, window_params = [{pipeline_mode = #tpu.pipeline_mode<synchronous>, transform_indices = @transform_0, window_bounds = array<i64: 32, 256>}, {transform_indices = @transform_1, window_bounds = array<i64: 256, 128>}, {pipeline_mode = #tpu.pipeline_mode<synchronous>, transform_indices = @transform_2, window_bounds = array<i64: 32, 1>}, {transform_indices = @transform_3, window_bounds = array<i64: 32, 128>}]} {
    %c0 = arith.constant 0 : index
    %c0_0 = arith.constant 0 : index
    %0 = vector.load %arg1[%c0, %c0_0] : memref<32x256xbf16, #tpu.memory_space<vmem>>, vector<32x256xbf16>
    %c0_1 = arith.constant 0 : index
    %c0_2 = arith.constant 0 : index
    %1 = vector.load %arg2[%c0_1, %c0_2] : memref<256x128xbf16, #tpu.memory_space<vmem>>, vector<256x128xbf16>
    %cst = arith.constant dense<0.000000e+00> : vector<32x128xf32>
    %2 = tpu.matmul %0, %1, %cst {dimension_numbers = #tpu.dot_dimension_numbers<[1], [0], [0], [1], [0, 0, 1, 1], [], []>} : vector<32x256xbf16>, vector<256x128xbf16>, vector<32x128xf32> -> vector<32x128xf32>
    %c0_3 = arith.constant 0 : index
    %c0_4 = arith.constant 0 : index
    %3 = vector.load %arg3[%c0_3, %c0_4] : memref<32x1xf32, #tpu.memory_space<vmem>>, vector<32x1xf32>
    %4 = vector.broadcast %3 : vector<32x1xf32> to vector<32x128xf32>
    %5 = arith.addf %2, %4 : vector<32x128xf32>
    %cst_5 = arith.constant 0.000000e+00 : f32
    %6 = vector.broadcast %cst_5 : f32 to vector<32x128xf32>
    %7 = arith.maximumf %5, %6 : vector<32x128xf32>
    %8 = arith.truncf %7 : vector<32x128xf32> to vector<32x128xbf16>
    %c0_6 = arith.constant 0 : index
    %c0_7 = arith.constant 0 : index
    %9 = vector.load %arg4[%c0_6, %c0_7] : memref<32x128xbf16, #tpu.memory_space<vmem>>, vector<32x128xbf16>
    tpu.vector_store %arg4[%c0_6, %c0_7], %8 {strides = array<i32>} : memref<32x128xbf16, #tpu.memory_space<vmem>>, vector<32x128xbf16>,
    return
  }
  func.func @transform_0(%arg0: i32) -> (i32, i32) {
    %c0_i32 = arith.constant 0 : i32
    %c0_i32_0 = arith.constant 0 : i32
    %c0_i32_1 = arith.constant 0 : i32
    return %c0_i32, %c0_i32_0 : i32, i32
  }
  func.func @transform_1(%arg0: i32) -> (i32, i32) {
    %c0_i32 = arith.constant 0 : i32
    %c0_i32_0 = arith.constant 0 : i32
    return %c0_i32, %arg0 : i32, i32
  }
  func.func @transform_2(%arg0: i32) -> (i32, i32) {
    %c0_i32 = arith.constant 0 : i32
    %c0_i32_0 = arith.constant 0 : i32
    %c0_i32_1 = arith.constant 0 : i32
    return %c0_i32, %c0_i32_0 : i32, i32
  }
  func.func @transform_3(%arg0: i32) -> (i32, i32) {
    %c0_i32 = arith.constant 0 : i32
    %c0_i32_0 = arith.constant 0 : i32
    return %c0_i32, %arg0 : i32, i32
  }
}

module attributes {stable_mosaic.version = 11 : i64} {
  func.func @_gemm_bias_relu_kernel(%arg0: i32, %arg1: memref<64x512xbf16, #tpu.memory_space<vmem>>, %arg2: memref<512x128xbf16, #tpu.memory_space<vmem>>, %arg3: memref<64x1xf32, #tpu.memory_space<vmem>>, %arg4: memref<64x128xbf16, #tpu.memory_space<vmem>>) attributes {dimension_semantics = [#tpu.dimension_semantics<parallel>], iteration_bounds = array<i64: 1>, scalar_prefetch = 0 : i64, scratch_operands = 0 : i64, tpu.core_type = #tpu.core_type<tc>, window_params = [{pipeline_mode = #tpu.pipeline_mode<synchronous>, transform_indices = @transform_0, window_bounds = array<i64: 64, 512>}, {transform_indices = @transform_1, window_bounds = array<i64: 512, 128>}, {pipeline_mode = #tpu.pipeline_mode<synchronous>, transform_indices = @transform_2, window_bounds = array<i64: 64, 1>}, {transform_indices = @transform_3, window_bounds = array<i64: 64, 128>}]} {
    %c0 = arith.constant 0 : index
    %c0_0 = arith.constant 0 : index
    %0 = vector.load %arg1[%c0, %c0_0] : memref<64x512xbf16, #tpu.memory_space<vmem>>, vector<64x512xbf16>
    %c0_1 = arith.constant 0 : index
    %c0_2 = arith.constant 0 : index
    %1 = vector.load %arg2[%c0_1, %c0_2] : memref<512x128xbf16, #tpu.memory_space<vmem>>, vector<512x128xbf16>
    %cst = arith.constant dense<0.000000e+00> : vector<64x128xf32>
    %2 = tpu.matmul %0, %1, %cst {dimension_numbers = #tpu.dot_dimension_numbers<[1], [0], [0], [1], [0, 0, 1, 1], [], []>} : vector<64x512xbf16>, vector<512x128xbf16>, vector<64x128xf32> -> vector<64x128xf32>
    %c0_3 = arith.constant 0 : index
    %c0_4 = arith.constant 0 : index
    %3 = vector.load %arg3[%c0_3, %c0_4] : memref<64x1xf32, #tpu.memory_space<vmem>>, vector<64x1xf32>
    %4 = vector.broadcast %3 : vector<64x1xf32> to vector<64x128xf32>
    %5 = arith.addf %2, %4 : vector<64x128xf32>
    %cst_5 = arith.constant 0.000000e+00 : f32
    %6 = vector.broadcast %cst_5 : f32 to vector<64x128xf32>
    %7 = arith.maximumf %5, %6 : vector<64x128xf32>
    %8 = arith.truncf %7 : vector<64x128xf32> to vector<64x128xbf16>
    %c0_6 = arith.constant 0 : index
    %c0_7 = arith.constant 0 : index
    %9 = vector.load %arg4[%c0_6, %c0_7] : memref<64x128xbf16, #tpu.memory_space<vmem>>, vector<64x128xbf16>
    tpu.vector_store %arg4[%c0_6, %c0_7], %8 {strides = array<i32>} : memref<64x128xbf16, #tpu.memory_space<vmem>>, vector<64x128xbf16>,
    return
  }
  func.func @transform_0(%arg0: i32) -> (i32, i32) {
    %c0_i32 = arith.constant 0 : i32
    %c0_i32_0 = arith.constant 0 : i32
    %c0_i32_1 = arith.constant 0 : i32
    return %c0_i32, %c0_i32_0 : i32, i32
  }
  func.func @transform_1(%arg0: i32) -> (i32, i32) {
    %c0_i32 = arith.constant 0 : i32
    %c0_i32_0 = arith.constant 0 : i32
    return %c0_i32, %arg0 : i32, i32
  }
  func.func @transform_2(%arg0: i32) -> (i32, i32) {
    %c0_i32 = arith.constant 0 : i32
    %c0_i32_0 = arith.constant 0 : i32
    %c0_i32_1 = arith.constant 0 : i32
    return %c0_i32, %c0_i32_0 : i32, i32
  }
  func.func @transform_3(%arg0: i32) -> (i32, i32) {
    %c0_i32 = arith.constant 0 : i32
    %c0_i32_0 = arith.constant 0 : i32
    return %c0_i32, %arg0 : i32, i32
  }
}

module attributes {stable_mosaic.version = 11 : i64} {
  func.func @_gemm_bias_relu_kernel(%arg0: i32, %arg1: memref<64x576xbf16, #tpu.memory_space<vmem>>, %arg2: memref<576x128xbf16, #tpu.memory_space<vmem>>, %arg3: memref<64x1xf32, #tpu.memory_space<vmem>>, %arg4: memref<64x128xf32, #tpu.memory_space<vmem>>) attributes {dimension_semantics = [#tpu.dimension_semantics<parallel>], iteration_bounds = array<i64: 1>, scalar_prefetch = 0 : i64, scratch_operands = 0 : i64, tpu.core_type = #tpu.core_type<tc>, window_params = [{pipeline_mode = #tpu.pipeline_mode<synchronous>, transform_indices = @transform_0, window_bounds = array<i64: 64, 576>}, {transform_indices = @transform_1, window_bounds = array<i64: 576, 128>}, {pipeline_mode = #tpu.pipeline_mode<synchronous>, transform_indices = @transform_2, window_bounds = array<i64: 64, 1>}, {transform_indices = @transform_3, window_bounds = array<i64: 64, 128>}]} {
    %c0 = arith.constant 0 : index
    %c0_0 = arith.constant 0 : index
    %0 = vector.load %arg1[%c0, %c0_0] : memref<64x576xbf16, #tpu.memory_space<vmem>>, vector<64x576xbf16>
    %c0_1 = arith.constant 0 : index
    %c0_2 = arith.constant 0 : index
    %1 = vector.load %arg2[%c0_1, %c0_2] : memref<576x128xbf16, #tpu.memory_space<vmem>>, vector<576x128xbf16>
    %cst = arith.constant dense<0.000000e+00> : vector<64x128xf32>
    %2 = tpu.matmul %0, %1, %cst {dimension_numbers = #tpu.dot_dimension_numbers<[1], [0], [0], [1], [0, 0, 1, 1], [], []>} : vector<64x576xbf16>, vector<576x128xbf16>, vector<64x128xf32> -> vector<64x128xf32>
    %c0_3 = arith.constant 0 : index
    %c0_4 = arith.constant 0 : index
    %3 = vector.load %arg3[%c0_3, %c0_4] : memref<64x1xf32, #tpu.memory_space<vmem>>, vector<64x1xf32>
    %4 = vector.broadcast %3 : vector<64x1xf32> to vector<64x128xf32>
    %5 = arith.addf %2, %4 : vector<64x128xf32>
    %cst_5 = arith.constant 0.000000e+00 : f32
    %6 = vector.broadcast %cst_5 : f32 to vector<64x128xf32>
    %7 = arith.maximumf %5, %6 : vector<64x128xf32>
    %c0_6 = arith.constant 0 : index
    %c0_7 = arith.constant 0 : index
    %8 = vector.load %arg4[%c0_6, %c0_7] : memref<64x128xf32, #tpu.memory_space<vmem>>, vector<64x128xf32>
    tpu.vector_store %arg4[%c0_6, %c0_7], %7 {strides = array<i32>} : memref<64x128xf32, #tpu.memory_space<vmem>>, vector<64x128xf32>,
    return
  }
  func.func @transform_0(%arg0: i32) -> (i32, i32) {
    %c0_i32 = arith.constant 0 : i32
    %c0_i32_0 = arith.constant 0 : i32
    %c0_i32_1 = arith.constant 0 : i32
    return %c0_i32, %c0_i32_0 : i32, i32
  }
  func.func @transform_1(%arg0: i32) -> (i32, i32) {
    %c0_i32 = arith.constant 0 : i32
    %c0_i32_0 = arith.constant 0 : i32
    return %c0_i32, %arg0 : i32, i32
  }
  func.func @transform_2(%arg0: i32) -> (i32, i32) {
    %c0_i32 = arith.constant 0 : i32
    %c0_i32_0 = arith.constant 0 : i32
    %c0_i32_1 = arith.constant 0 : i32
    return %c0_i32, %c0_i32_0 : i32, i32
  }
  func.func @transform_3(%arg0: i32) -> (i32, i32) {
    %c0_i32 = arith.constant 0 : i32
    %c0_i32_0 = arith.constant 0 : i32
    return %c0_i32, %arg0 : i32, i32
  }
}

</mosaic_0001>

<bundles_post_ra>
// kernel: dqn_image_block.3
= control target key start
LH: loop header
LB: loop body
LE: loop exit
PB: predicated region body
PF: predicated region fallthrough
CT: control target
= control target key end

     0   :  { %v376_v1 = vmov 0   ;;  %s475_s1 = inlined_call_operand.vmem [shape: bf16[256,128], index: 1, kind: input, shape index: {}]   ;;  %s476_s0 = inlined_call_operand.vmem [shape: bf16[32,256], index: 0, kind: input, shape index: {}]   ;;  %s477_s2 = inlined_call_operand.vmem [shape: f32[32,1], index: 2, kind: input, shape index: {}]   ;;  %s478_s3 = inlined_call_operand.vmem [shape: bf16[32,128], index: 3, kind: output, shape index: {}]  }
   0x1   :  { %v354_v0 = vld [vmem:[%s475_s1 + $0x40] sm:$0xff]   ;;  %353 = vset.pattern.permute.xlu1 %v376_v1  ;;  %352 = vset.pattern.permute.xlu0 %v376_v1  ;;  %v356_v3 = vld [vmem:[%s475_s1 + $0x48] sm:$0xff]   ;;  %v358_v5 = vld [vmem:[%s475_s1 + $0x50] sm:$0xff]  }
   0x2   :  { %v355_v2 = vld [vmem:[%s475_s1] sm:$0xff]   ;;  %307 = vmatprep.subr.bf16.mxu0 %v354_v0  ;;  %335 = vmatprep.subr.bf16.mxu1 %v354_v0  ;;  %v357_v4 = vld [vmem:[%s475_s1 + $0x8] sm:$0xff]   ;;  %v359_v6 = vld [vmem:[%s475_s1 + $0x10] sm:$0xff]  }
   0x3   :  { %308 = vmatpush3.bf16.msra.mxu0 %v355_v2  ;;  %343 = vmatpush3.bf16.msra.mxu1 %v355_v2  ;;  %v360_v7 = vld [vmem:[%s475_s1 + $0x58] sm:$0xff]   ;;  %v362_v9 = vld [vmem:[%s475_s1 + $0x60] sm:$0xff]   ;;  %v364_v11 = vld [vmem:[%s475_s1 + $0x68] sm:$0xff]  }
   0x4   :  { %309 = vmatprep.subr.bf16.mxu0 %v356_v3  ;;  %336 = vmatprep.subr.bf16.mxu1 %v356_v3  ;;  %v361_v8 = vld [vmem:[%s475_s1 + $0x18] sm:$0xff]   ;;  %v363_v10 = vld [vmem:[%s475_s1 + $0x20] sm:$0xff]   ;;  %v365_v14 = vld [vmem:[%s475_s1 + $0x28] sm:$0xff]  }
   0x5   :  { %v372_v12 = vld [vmem:[%s476_s0 + $0x4] ss:$8 sps:$4 sm:$0xff]   ;;  %v375_v13 = vld [vmem:[%s476_s0 + $0x14] ss:$8 sps:$4 sm:$0xff]   ;;  %v370_v23 = vld [vmem:[%s476_s0] ss:$8 sps:$4 sm:$0xff]  }
   0x6   :  { %v53_v15 = vld [vmem:[%s477_s2 + $0x10] sm:$0xff]  ;;  %v51_v16 = vld [vmem:[%s477_s2] sm:$0xff]  ;;  %223 = vmatprep.mubr.bf16.mxu0 %v372_v12  ;;  %231 = vmatprep.mubr.bf16.mxu1 %v375_v13  ;;  %v54_v19 = vld [vmem:[%s477_s2 + $0x18] sm:$0xff] }
   0x7   :  { %310 = vmatpush3.bf16.msra.mxu0 %v357_v4  ;;  %344 = vmatpush3.bf16.msra.mxu1 %v357_v4  ;;  %v366_v17 = vld [vmem:[%s475_s1 + $0x70] sm:$0xff]   ;;  %v52_v20 = vld [vmem:[%s477_s2 + $0x8] sm:$0xff]  ;;  %v368_v21 = vld [vmem:[%s475_s1 + $0x78] sm:$0xff]  }
   0x8   :  { %311 = vmatprep.subr.bf16.mxu0 %v358_v5  ;;  %337 = vmatprep.subr.bf16.mxu1 %v358_v5  ;;  %v367_v18 = vld [vmem:[%s475_s1 + $0x30] sm:$0xff]   ;;  %v369_v22 = vld [vmem:[%s475_s1 + $0x38] sm:$0xff]  }
   0x9   :  { %67 = vperm.xlu1 %353, %v53_v15   ;;  %57 = vperm.xlu0 %352, %v51_v16   ;;  %v373_v24 = vld [vmem:[%s476_s0 + $0x10] ss:$8 sps:$4 sm:$0xff]  }
   0xb   :  { %312 = vmatpush3.bf16.msra.mxu0 %v359_v6  ;;  %345 = vmatpush3.bf16.msra.mxu1 %v359_v6 }
   0xc   :  { %313 = vmatprep.subr.bf16.mxu0 %v360_v7  ;;  %338 = vmatprep.subr.bf16.mxu1 %v360_v7 }
   0xd   :  { %72 = vperm.xlu1 %353, %v54_v19   ;;  %62 = vperm.xlu0 %352, %v52_v20  }
   0xf   :  { %314 = vmatpush3.bf16.msra.mxu0 %v361_v8  ;;  %346 = vmatpush3.bf16.msra.mxu1 %v361_v8 }
  0x10   :  { %315 = vmatprep.subr.bf16.mxu0 %v362_v9  ;;  %339 = vmatprep.subr.bf16.mxu1 %v362_v9 }
  0x13   :  { %316 = vmatpush3.bf16.msra.mxu0 %v363_v10  ;;  %347 = vmatpush3.bf16.msra.mxu1 %v363_v10 }
  0x14   :  { %317 = vmatprep.subr.bf16.mxu0 %v364_v11  ;;  %340 = vmatprep.subr.bf16.mxu1 %v364_v11 }
  0x17   :  { %318 = vmatpush3.bf16.msra.mxu0 %v365_v14  ;;  %348 = vmatpush3.bf16.msra.mxu1 %v365_v14 }
  0x18   :  { %319 = vmatprep.subr.bf16.mxu0 %v366_v17  ;;  %341 = vmatprep.subr.bf16.mxu1 %v366_v17 }
  0x1b   :  { %320 = vmatpush3.bf16.msra.mxu0 %v367_v18  ;;  %349 = vmatpush3.bf16.msra.mxu1 %v367_v18 }
  0x1c   :  { %321 = vmatprep.subr.bf16.mxu0 %v368_v21  ;;  %342 = vmatprep.subr.bf16.mxu1 %v368_v21 }
  0x1f   :  { %322 = vmatpush3.bf16.msra.mxu0 %v369_v22  ;;  %350 = vmatpush3.bf16.msra.mxu1 %v369_v22 }
  0x22   :  { %224 = vmatmul.mubr.bf16.vlgmr.msra.gmra.mrb[0].mxu0 %v370_v23  ;;  %232 = vmatmul.mubr.bf16.vlgmr.msra.gmra.mrb[0].mxu1 %v373_v24 }
  0x88   :  { %v68_v25 = vpop.permute.xlu1 %67  ;;  %v58_v26 = vpop.permute.xlu0 %57 }
  0x8c   :  { %v73_v41 = vpop.permute.xlu1 %72  ;;  %v63_v42 = vpop.permute.xlu0 %62 }
  0xf5   :  { %v323_v27 = vpop.f32.mrb[0].mxu0  ;;  %v329_v28 = vpop.f32.mrb[0].mxu1 }
  0xf6   :  { %v324_v29 = vpop.f32.mrb[1].mxu0  ;;  %v330_v30 = vpop.f32.mrb[1].mxu1 }
  0xf7   :  { %v325_v31 = vadd.f32 %v324_v29, %v323_v27  ;;  %v331_v32 = vadd.f32 %v330_v30, %v329_v28  ;;  %v326_v33 = vpop.f32.mrb[2].mxu0  ;;  %v332_v34 = vpop.f32.mrb[2].mxu1 }
  0xf8   :  { %v327_v35 = vpop.f32.mrb[3].mxu0  ;;  %v333_v36 = vpop.f32.mrb[3].mxu1 }
  0xf9   :  { %v226_v37 = vadd.f32 %v325_v31, %v58_v26  ;;  %v234_v38 = vadd.f32 %v331_v32, %v68_v25  ;;  %v328_v39 = vadd.f32 %v327_v35, %v326_v33  ;;  %v334_v40 = vadd.f32 %v333_v36, %v332_v34 }
  0xfb   :  { %v229_v43 = vadd.f32 %v328_v39, %v63_v42  ;;  %v237_v44 = vadd.f32 %v334_v40, %v73_v41  ;;  %v240_v45 = vmax.f32 %v226_v37, 0.0  ;;  %v242_v46 = vmax.f32 %v234_v38, 0.0 }
  0xfd   :  { %v241_v47 = vmax.f32 %v229_v43, 0.0  ;;  %v243_v48 = vmax.f32 %v237_v44, 0.0 }
  0xff   :  { %v299_v49 = vpack.c.bf16 %v241_v47, %v240_v45  ;;  %v304_v50 = vpack.c.bf16 %v243_v48, %v242_v46 }
 0x101   :  { %300 = vst [vmem:[%s478_s3] sm:$0xff] %v299_v49   ;;  %306 = vst [vmem:[%s478_s3 + $0x8] sm:$0xff] %v304_v50  }

// kernel: dqn_image_block.4
= control target key start
LH: loop header
LB: loop body
LE: loop exit
PB: predicated region body
PF: predicated region fallthrough
CT: control target
= control target key end

     0   :  { %v823_v1 = vmov 0   ;;  %s1024_s1 = inlined_call_operand.vmem [shape: bf16[512,128], index: 1, kind: input, shape index: {}]   ;;  %s1025_s0 = inlined_call_operand.vmem [shape: bf16[64,512], index: 0, kind: input, shape index: {}]   ;;  %s1026_s2 = inlined_call_operand.vmem [shape: f32[64,1], index: 2, kind: input, shape index: {}]   ;;  %s1027_s3 = inlined_call_operand.vmem [shape: bf16[64,128], index: 3, kind: output, shape index: {}]  }
   0x1   :  { %v767_v0 = vld [vmem:[%s1024_s1 + $0x40] sm:$0xff]   ;;  %765 = vset.pattern.permute.xlu0 %v823_v1  ;;  %766 = vset.pattern.permute.xlu1 %v823_v1  ;;  %v771_v5 = vld [vmem:[%s1024_s1 + $0x48] sm:$0xff]   ;;  %v775_v9 = vld [vmem:[%s1024_s1 + $0x50] sm:$0xff]  }
   0x2   :  { %v768_v2 = vld [vmem:[%s1024_s1 + $0xc0] sm:$0xff]   ;;  %684 = vmatprep.subr.bf16.mxu0 %v767_v0  ;;  %v772_v6 = vld [vmem:[%s1024_s1 + $0xc8] sm:$0xff]   ;;  %v776_v10 = vld [vmem:[%s1024_s1 + $0xd0] sm:$0xff]  }
   0x3   :  { %v769_v3 = vld [vmem:[%s1024_s1] sm:$0xff]   ;;  %724 = vmatprep.subr.bf16.mxu1 %v768_v2  ;;  %v773_v7 = vld [vmem:[%s1024_s1 + $0x8] sm:$0xff]   ;;  %v777_v11 = vld [vmem:[%s1024_s1 + $0x10] sm:$0xff]  }
   0x4   :  { %v770_v4 = vld [vmem:[%s1024_s1 + $0x80] sm:$0xff]   ;;  %685 = vmatpush3.bf16.msra.mxu0 %v769_v3  ;;  %v774_v8 = vld [vmem:[%s1024_s1 + $0x88] sm:$0xff]   ;;  %v778_v12 = vld [vmem:[%s1024_s1 + $0x90] sm:$0xff]  }
   0x5   :  { %725 = vmatpush3.bf16.msra.mxu1 %v770_v4  ;;  %686 = vmatprep.subr.bf16.mxu0 %v771_v5  ;;  %v779_v13 = vld [vmem:[%s1024_s1 + $0x58] sm:$0xff]   ;;  %v783_v17 = vld [vmem:[%s1024_s1 + $0x60] sm:$0xff]   ;;  %v787_v21 = vld [vmem:[%s1024_s1 + $0x68] sm:$0xff]  }
   0x6   :  { %726 = vmatprep.subr.bf16.mxu1 %v772_v6  ;;  %v780_v14 = vld [vmem:[%s1024_s1 + $0xd8] sm:$0xff]   ;;  %v784_v18 = vld [vmem:[%s1024_s1 + $0xe0] sm:$0xff]   ;;  %v788_v22 = vld [vmem:[%s1024_s1 + $0xe8] sm:$0xff]  }
   0x7   :  { %v781_v15 = vld [vmem:[%s1024_s1 + $0x18] sm:$0xff]   ;;  %v785_v19 = vld [vmem:[%s1024_s1 + $0x20] sm:$0xff]   ;;  %v789_v23 = vld [vmem:[%s1024_s1 + $0x28] sm:$0xff]  }
   0x8   :  { %687 = vmatpush3.bf16.msra.mxu0 %v773_v7  ;;  %v782_v16 = vld [vmem:[%s1024_s1 + $0x98] sm:$0xff]   ;;  %v786_v20 = vld [vmem:[%s1024_s1 + $0xa0] sm:$0xff]   ;;  %v790_v24 = vld [vmem:[%s1024_s1 + $0xa8] sm:$0xff]  }
   0x9   :  { %727 = vmatpush3.bf16.msra.mxu1 %v774_v8  ;;  %688 = vmatprep.subr.bf16.mxu0 %v775_v9  ;;  %v791_v25 = vld [vmem:[%s1024_s1 + $0x70] sm:$0xff]   ;;  %v795_v29 = vld [vmem:[%s1024_s1 + $0x78] sm:$0xff]   ;;  %v95_v43 = vld [vmem:[%s1026_s2] sm:$0xff] }
   0xa   :  { %728 = vmatprep.subr.bf16.mxu1 %v776_v10  ;;  %v792_v26 = vld [vmem:[%s1024_s1 + $0xf0] sm:$0xff]   ;;  %v796_v30 = vld [vmem:[%s1024_s1 + $0xf8] sm:$0xff]   ;;  %105 = vperm.xlu0 %765, %v95_v43   ;;  %v96_v45 = vld [vmem:[%s1026_s2 + $0x8] sm:$0xff] }
   0xb   :  { %v793_v27 = vld [vmem:[%s1024_s1 + $0x30] sm:$0xff]   ;;  %v797_v31 = vld [vmem:[%s1024_s1 + $0x38] sm:$0xff]   ;;  %v99_v48 = vld [vmem:[%s1026_s2 + $0x20] sm:$0xff] }
   0xc   :  { %689 = vmatpush3.bf16.msra.mxu0 %v777_v11  ;;  %v794_v28 = vld [vmem:[%s1024_s1 + $0xb0] sm:$0xff]   ;;  %v798_v32 = vld [vmem:[%s1024_s1 + $0xb8] sm:$0xff]   ;;  %v100_v51 = vld [vmem:[%s1026_s2 + $0x28] sm:$0xff] }
   0xd   :  { %729 = vmatpush3.bf16.msra.mxu1 %v778_v12  ;;  %690 = vmatprep.subr.bf16.mxu0 %v779_v13  ;;  %v799_v33 = vld [vmem:[%s1025_s0] ss:$16 sps:$4 sm:$0xff]   ;;  %v801_v34 = vld [vmem:[%s1025_s0 + $0x4] ss:$16 sps:$4 sm:$0xff]   ;;  %v802_v35 = vld [vmem:[%s1025_s0 + $0x8] ss:$16 sps:$4 sm:$0xff]  }
   0xe   :  { %730 = vmatprep.subr.bf16.mxu1 %v780_v14  ;;  %v804_v36 = vld [vmem:[%s1025_s0 + $0xc] ss:$16 sps:$4 sm:$0xff]   ;;  %447 = vmatprep.mubr.bf16.mxu0 %v801_v34  ;;  %v805_v37 = vld [vmem:[%s1025_s0 + $0x24] ss:$16 sps:$4 sm:$0xff]   ;;  %v809_v39 = vld [vmem:[%s1025_s0 + $0x20] ss:$16 sps:$4 sm:$0xff]  }
   0xf   :  { %512 = vmatprep.mubr.bf16.mxu1 %v804_v36  ;;  %v807_v38 = vld [vmem:[%s1025_s0 + $0x2c] ss:$16 sps:$4 sm:$0xff]   ;;  %v810_v40 = vld [vmem:[%s1025_s0 + $0x28] ss:$16 sps:$4 sm:$0xff]   ;;  %v811_v41 = vld [vmem:[%s1025_s0 + $0x44] ss:$16 sps:$4 sm:$0xff]   ;;  %110 = vperm.xlu0 %765, %v96_v45  }
  0x10   :  { %691 = vmatpush3.bf16.msra.mxu0 %v781_v15  ;;  %v813_v42 = vld [vmem:[%s1025_s0 + $0x4c] ss:$16 sps:$4 sm:$0xff]   ;;  %v97_v44 = vld [vmem:[%s1026_s2 + $0x10] sm:$0xff]  ;;  %v816_v49 = vld [vmem:[%s1025_s0 + $0x48] ss:$16 sps:$4 sm:$0xff]  }
  0x11   :  { %731 = vmatpush3.bf16.msra.mxu1 %v782_v16  ;;  %692 = vmatprep.subr.bf16.mxu0 %v783_v17  ;;  %v98_v46 = vld [vmem:[%s1026_s2 + $0x18] sm:$0xff]  ;;  %v815_v47 = vld [vmem:[%s1025_s0 + $0x40] ss:$16 sps:$4 sm:$0xff]   ;;  %v817_v50 = vld [vmem:[%s1025_s0 + $0x64] ss:$16 sps:$4 sm:$0xff]  }
  0x12   :  { %732 = vmatprep.subr.bf16.mxu1 %v784_v18  ;;  %115 = vperm.xlu1 %766, %v97_v44   ;;  %v819_v52 = vld [vmem:[%s1025_s0 + $0x6c] ss:$16 sps:$4 sm:$0xff]   ;;  %v101_v53 = vld [vmem:[%s1026_s2 + $0x30] sm:$0xff]  ;;  %v822_v56 = vld [vmem:[%s1025_s0 + $0x68] ss:$16 sps:$4 sm:$0xff]  }
  0x13   :  { %125 = vperm.xlu0 %765, %v99_v48   ;;  %v102_v54 = vld [vmem:[%s1026_s2 + $0x38] sm:$0xff]  ;;  %v821_v55 = vld [vmem:[%s1025_s0 + $0x60] ss:$16 sps:$4 sm:$0xff]  }
  0x14   :  { %693 = vmatpush3.bf16.msra.mxu0 %v785_v19 }
  0x15   :  { %733 = vmatpush3.bf16.msra.mxu1 %v786_v20  ;;  %694 = vmatprep.subr.bf16.mxu0 %v787_v21 }
  0x16   :  { %734 = vmatprep.subr.bf16.mxu1 %v788_v22  ;;  %120 = vperm.xlu1 %766, %v98_v46  }
  0x17   :  { %135 = vperm.xlu0 %765, %v101_v53  }
  0x18   :  { %695 = vmatpush3.bf16.msra.mxu0 %v789_v23 }
  0x19   :  { %735 = vmatpush3.bf16.msra.mxu1 %v790_v24  ;;  %696 = vmatprep.subr.bf16.mxu0 %v791_v25 }
  0x1a   :  { %736 = vmatprep.subr.bf16.mxu1 %v792_v26  ;;  %130 = vperm.xlu1 %766, %v100_v51  }
  0x1c   :  { %697 = vmatpush3.bf16.msra.mxu0 %v793_v27 }
  0x1d   :  { %737 = vmatpush3.bf16.msra.mxu1 %v794_v28  ;;  %698 = vmatprep.subr.bf16.mxu0 %v795_v29 }
  0x1e   :  { %738 = vmatprep.subr.bf16.mxu1 %v796_v30  ;;  %140 = vperm.xlu1 %766, %v102_v54  }
  0x20   :  { %699 = vmatpush3.bf16.msra.mxu0 %v797_v31 }
  0x21   :  { %739 = vmatpush3.bf16.msra.mxu1 %v798_v32 }
  0x23   :  { %448 = vmatmul.mubr.bf16.vlgmr.msra.gmra.mrb[0].mxu0 %v799_v33 }
  0x24   :  { %513 = vmatmul.mubr.bf16.vlgmr.msra.gmra.mrb[0].mxu1 %v802_v35  ;;  %455 = vmatprep.mubr.bf16.mxu0 %v805_v37 }
  0x25   :  { %520 = vmatprep.mubr.bf16.mxu1 %v807_v38 }
  0x2b   :  { %456 = vmatmul.mubr.bf16.gmra.mrb[4].mxu0 %v809_v39 }
  0x2c   :  { %521 = vmatmul.mubr.bf16.gmra.mrb[4].mxu1 %v810_v40  ;;  %463 = vmatprep.mubr.bf16.mxu0 %v811_v41 }
  0x2d   :  { %528 = vmatprep.mubr.bf16.mxu1 %v813_v42 }
  0x33   :  { %464 = vmatmul.mubr.bf16.gmra.mrb[8].mxu0 %v815_v47 }
  0x34   :  { %529 = vmatmul.mubr.bf16.gmra.mrb[8].mxu1 %v816_v49  ;;  %471 = vmatprep.mubr.bf16.mxu0 %v817_v50 }
  0x35   :  { %536 = vmatprep.mubr.bf16.mxu1 %v819_v52 }
  0x3b   :  { %472 = vmatmul.mubr.bf16.gmra.mrb[12].mxu0 %v821_v55 }
  0x3c   :  { %537 = vmatmul.mubr.bf16.gmra.mrb[12].mxu1 %v822_v56 }
  0x89   :  { %v106_v57 = vpop.permute.xlu0 %105 }
  0x8e   :  { %v111_v59 = vpop.permute.xlu0 %110 }
  0x91   :  { %v116_v10 = vpop.permute.xlu1 %115 }
  0x92   :  { %v126_v32 = vpop.permute.xlu0 %125 }
  0x95   :  { %v121_v27 = vpop.permute.xlu1 %120 }
  0x96   :  { %v136_v52 = vpop.permute.xlu0 %135 }
  0x99   :  { %v131_v48 = vpop.permute.xlu1 %130 }
  0xf6   :  { %v700_v58 = vpop.f32.mrb[0].mxu0 }
  0xf7   :  { %v740_v60 = vpop.f32.mrb[0].mxu1  ;;  %v701_v61 = vpop.f32.mrb[1].mxu0 }
  0xf8   :  { %v702_v62 = vadd.f32 %v701_v61, %v700_v58  ;;  %v741_v63 = vpop.f32.mrb[1].mxu1  ;;  %v703_v0 = vpop.f32.mrb[2].mxu0 }
  0xf9   :  { %v742_v1 = vadd.f32 %v741_v63, %v740_v60  ;;  %v743_v2 = vpop.f32.mrb[2].mxu1  ;;  %v704_v3 = vpop.f32.mrb[3].mxu0 }
  0xfa   :  { %v450_v4 = vadd.f32 %v702_v62, %v106_v57  ;;  %v705_v5 = vadd.f32 %v704_v3, %v703_v0  ;;  %v744_v6 = vpop.f32.mrb[3].mxu1 }
  0xfb   :  { %v745_v7 = vadd.f32 %v744_v6, %v743_v2 }
  0xfc   :  { %v515_v8 = vadd.f32 %v742_v1, %v450_v4  ;;  %v453_v9 = vadd.f32 %v705_v5, %v111_v59  ;;  %v141_v5 = vpop.permute.xlu1 %140 }
  0xfe   :  { %v518_v11 = vadd.f32 %v745_v7, %v453_v9  ;;  %v706_v12 = vpop.f32.mrb[4].mxu0  ;;  %v545_v15 = vmax.f32 %v515_v8, 0.0 }
  0xff   :  { %v746_v13 = vpop.f32.mrb[4].mxu1  ;;  %v707_v14 = vpop.f32.mrb[5].mxu0 }
 0x100   :  { %v546_v16 = vmax.f32 %v518_v11, 0.0  ;;  %v708_v17 = vadd.f32 %v707_v14, %v706_v12  ;;  %v747_v18 = vpop.f32.mrb[5].mxu1  ;;  %v709_v19 = vpop.f32.mrb[6].mxu0 }
 0x101   :  { %v748_v20 = vadd.f32 %v747_v18, %v746_v13  ;;  %v749_v21 = vpop.f32.mrb[6].mxu1  ;;  %v710_v22 = vpop.f32.mrb[7].mxu0 }
 0x102   :  { %v664_v23 = vpack.c.bf16 %v546_v16, %v545_v15  ;;  %v458_v24 = vadd.f32 %v708_v17, %v116_v10  ;;  %v711_v25 = vadd.f32 %v710_v22, %v709_v19  ;;  %v750_v26 = vpop.f32.mrb[7].mxu1 }
 0x103   :  { %v751_v28 = vadd.f32 %v750_v26, %v749_v21 }
 0x104   :  { %665 = vst [vmem:[%s1027_s3] sm:$0xff] %v664_v23   ;;  %v523_v29 = vadd.f32 %v748_v20, %v458_v24  ;;  %v461_v30 = vadd.f32 %v711_v25, %v121_v27 }
 0x106   :  { %v526_v31 = vadd.f32 %v751_v28, %v461_v30  ;;  %v712_v33 = vpop.f32.mrb[8].mxu0  ;;  %v547_v36 = vmax.f32 %v523_v29, 0.0 }
 0x107   :  { %v752_v34 = vpop.f32.mrb[8].mxu1  ;;  %v713_v35 = vpop.f32.mrb[9].mxu0 }
 0x108   :  { %v548_v37 = vmax.f32 %v526_v31, 0.0  ;;  %v714_v38 = vadd.f32 %v713_v35, %v712_v33  ;;  %v753_v39 = vpop.f32.mrb[9].mxu1  ;;  %v715_v40 = vpop.f32.mrb[10].mxu0 }
 0x109   :  { %v754_v41 = vadd.f32 %v753_v39, %v752_v34  ;;  %v755_v42 = vpop.f32.mrb[10].mxu1  ;;  %v716_v43 = vpop.f32.mrb[11].mxu0 }
 0x10a   :  { %v669_v44 = vpack.c.bf16 %v548_v37, %v547_v36  ;;  %v466_v45 = vadd.f32 %v714_v38, %v126_v32  ;;  %v717_v46 = vadd.f32 %v716_v43, %v715_v40  ;;  %v756_v47 = vpop.f32.mrb[11].mxu1 }
 0x10b   :  { %v757_v49 = vadd.f32 %v756_v47, %v755_v42 }
 0x10c   :  { %681 = vst [vmem:[%s1027_s3 + $0x8] sm:$0xff] %v669_v44   ;;  %v531_v50 = vadd.f32 %v754_v41, %v466_v45  ;;  %v469_v51 = vadd.f32 %v717_v46, %v131_v48 }
 0x10e   :  { %v534_v53 = vadd.f32 %v757_v49, %v469_v51  ;;  %v718_v54 = vpop.f32.mrb[12].mxu0  ;;  %v549_v57 = vmax.f32 %v531_v50, 0.0 }
 0x10f   :  { %v758_v55 = vpop.f32.mrb[12].mxu1  ;;  %v719_v56 = vpop.f32.mrb[13].mxu0 }
 0x110   :  { %v550_v58 = vmax.f32 %v534_v53, 0.0  ;;  %v720_v59 = vadd.f32 %v719_v56, %v718_v54  ;;  %v759_v60 = vpop.f32.mrb[13].mxu1  ;;  %v721_v61 = vpop.f32.mrb[14].mxu0 }
 0x111   :  { %v760_v62 = vadd.f32 %v759_v60, %v758_v55  ;;  %v761_v63 = vpop.f32.mrb[14].mxu1  ;;  %v722_v0 = vpop.f32.mrb[15].mxu0 }
 0x112   :  { %v674_v1 = vpack.c.bf16 %v550_v58, %v549_v57  ;;  %v474_v2 = vadd.f32 %v720_v59, %v136_v52  ;;  %v723_v3 = vadd.f32 %v722_v0, %v721_v61  ;;  %v762_v4 = vpop.f32.mrb[15].mxu1 }
 0x113   :  { %v763_v6 = vadd.f32 %v762_v4, %v761_v63 }
 0x114   :  { %682 = vst [vmem:[%s1027_s3 + $0x10] sm:$0xff] %v674_v1   ;;  %v539_v7 = vadd.f32 %v760_v62, %v474_v2  ;;  %v477_v8 = vadd.f32 %v723_v3, %v141_v5 }
 0x116   :  { %v542_v9 = vadd.f32 %v763_v6, %v477_v8  ;;  %v551_v10 = vmax.f32 %v539_v7, 0.0 }
 0x118   :  { %v552_v11 = vmax.f32 %v542_v9, 0.0 }
 0x11a   :  { %v679_v12 = vpack.c.bf16 %v552_v11, %v551_v10 }
 0x11c   :  { %683 = vst [vmem:[%s1027_s3 + $0x18] sm:$0xff] %v679_v12  }

// kernel: dqn_image_block.5
= control target key start
LH: loop header
LB: loop body
LE: loop exit
PB: predicated region body
PF: predicated region fallthrough
CT: control target
= control target key end

     0   :  { %v942_v1 = vmov 0   ;;  %vm475_vm0 = vcmask 523264   ;;  %s1186_s1 = inlined_call_operand.vmem [shape: bf16[576,128], index: 1, kind: input, shape index: {}]   ;;  %s1187_s0 = inlined_call_operand.vmem [shape: bf16[64,576], index: 0, kind: input, shape index: {}]   ;;  %s1188_s2 = inlined_call_operand.vmem [shape: f32[64,1], index: 2, kind: input, shape index: {}]   ;;  %s1189_s3 = inlined_call_operand.vmem [shape: f32[64,128], index: 3, kind: output, shape index: {}]  }
   0x1   :  { %v878_v0 = vld [vmem:[%s1186_s1 + $0x40] sm:$0xff]   ;;  %876 = vset.pattern.permute.xlu0 %v942_v1  ;;  %877 = vset.pattern.permute.xlu1 %v942_v1  ;;  %v882_v5 = vld [vmem:[%s1186_s1 + $0x48] sm:$0xff]   ;;  %v886_v9 = vld [vmem:[%s1186_s1 + $0x50] sm:$0xff]  }
   0x2   :  { %v879_v2 = vld [vmem:[%s1186_s1 + $0xc0] sm:$0xff]   ;;  %763 = vmatprep.subr.bf16.mxu0 %v878_v0  ;;  %v883_v6 = vld [vmem:[%s1186_s1 + $0xc8] sm:$0xff]   ;;  %v887_v10 = vld [vmem:[%s1186_s1 + $0xd0] sm:$0xff]  }
   0x3   :  { %v880_v3 = vld [vmem:[%s1186_s1] sm:$0xff]   ;;  %803 = vmatprep.subr.bf16.mxu1 %v879_v2  ;;  %v884_v7 = vld [vmem:[%s1186_s1 + $0x8] sm:$0xff]   ;;  %v888_v11 = vld [vmem:[%s1186_s1 + $0x10] sm:$0xff]  }
   0x4   :  { %v881_v4 = vld [vmem:[%s1186_s1 + $0x80] sm:$0xff]   ;;  %764 = vmatpush3.bf16.msra.mxu0 %v880_v3  ;;  %v885_v8 = vld [vmem:[%s1186_s1 + $0x88] sm:$0xff]   ;;  %v889_v12 = vld [vmem:[%s1186_s1 + $0x90] sm:$0xff]  }
   0x5   :  { %804 = vmatpush3.bf16.msra.mxu1 %v881_v4  ;;  %765 = vmatprep.subr.bf16.mxu0 %v882_v5  ;;  %v890_v13 = vld [vmem:[%s1186_s1 + $0x58] sm:$0xff]   ;;  %v894_v17 = vld [vmem:[%s1186_s1 + $0x60] sm:$0xff]   ;;  %v898_v21 = vld [vmem:[%s1186_s1 + $0x68] sm:$0xff]  }
   0x6   :  { %805 = vmatprep.subr.bf16.mxu1 %v883_v6  ;;  %v891_v14 = vld [vmem:[%s1186_s1 + $0xd8] sm:$0xff]   ;;  %v895_v18 = vld [vmem:[%s1186_s1 + $0xe0] sm:$0xff]   ;;  %v899_v22 = vld [vmem:[%s1186_s1 + $0xe8] sm:$0xff]  }
   0x7   :  { %v892_v15 = vld [vmem:[%s1186_s1 + $0x18] sm:$0xff]   ;;  %v896_v19 = vld [vmem:[%s1186_s1 + $0x20] sm:$0xff]   ;;  %v900_v23 = vld [vmem:[%s1186_s1 + $0x28] sm:$0xff]  }
   0x8   :  { %766 = vmatpush3.bf16.msra.mxu0 %v884_v7  ;;  %v893_v16 = vld [vmem:[%s1186_s1 + $0x98] sm:$0xff]   ;;  %v897_v20 = vld [vmem:[%s1186_s1 + $0xa0] sm:$0xff]   ;;  %v901_v24 = vld [vmem:[%s1186_s1 + $0xa8] sm:$0xff]  }
   0x9   :  { %806 = vmatpush3.bf16.msra.mxu1 %v885_v8  ;;  %767 = vmatprep.subr.bf16.mxu0 %v886_v9  ;;  %v902_v25 = vld [vmem:[%s1186_s1 + $0x70] sm:$0xff]   ;;  %v906_v29 = vld [vmem:[%s1186_s1 + $0x78] sm:$0xff]   ;;  %v915_v36 = vld [vmem:[%s1187_s0 + $0xc] ss:$20 sps:$4 sm:$0xff]  }
   0xa   :  { %807 = vmatprep.subr.bf16.mxu1 %v887_v10  ;;  %v903_v26 = vld [vmem:[%s1186_s1 + $0xf0] sm:$0xff]   ;;  %v907_v30 = vld [vmem:[%s1186_s1 + $0xf8] sm:$0xff]   ;;  %v916_v37 = vld [vmem:[%s1186_s1 + $0x100] sm:$0xff]   ;;  %585 = vmatprep.mubr.bf16.mxu1 %v915_v36 }
   0xb   :  { %v904_v27 = vld [vmem:[%s1186_s1 + $0x30] sm:$0xff]   ;;  %v908_v31 = vld [vmem:[%s1186_s1 + $0x38] sm:$0xff]   ;;  %v917_v38 = vld [vmem:[%s1187_s0 + $0x2c] ss:$20 sps:$4 sm:$0xff]  }
   0xc   :  { %768 = vmatpush3.bf16.msra.mxu0 %v888_v11  ;;  %v905_v28 = vld [vmem:[%s1186_s1 + $0xb0] sm:$0xff]   ;;  %v909_v32 = vld [vmem:[%s1186_s1 + $0xb8] sm:$0xff]   ;;  %v923_v40 = vld [vmem:[%s1186_s1 + $0x108] sm:$0xff]  }
   0xd   :  { %808 = vmatpush3.bf16.msra.mxu1 %v889_v12  ;;  %769 = vmatprep.subr.bf16.mxu0 %v890_v13  ;;  %v910_v33 = vld [vmem:[%s1187_s0] ss:$20 sps:$4 sm:$0xff]   ;;  %v912_v34 = vld [vmem:[%s1187_s0 + $0x4] ss:$20 sps:$4 sm:$0xff]   ;;  %v913_v35 = vld [vmem:[%s1187_s0 + $0x8] ss:$20 sps:$4 sm:$0xff]  }
   0xe   :  { %809 = vmatprep.subr.bf16.mxu1 %v891_v14  ;;  %520 = vmatprep.mubr.bf16.mxu0 %v912_v34  ;;  %v919_v39 = vld [vmem:[%s1187_s0 + $0x34] ss:$20 sps:$4 sm:$0xff]   ;;  %v922_v42 = vld [vmem:[%s1187_s0 + $0x30] ss:$20 sps:$4 sm:$0xff]   ;;  %v937_v46 = vld [vmem:[%s1186_s1 + $0x118] sm:$0xff]  }
   0xf   :  { %v921_v41 = vld [vmem:[%s1187_s0 + $0x28] ss:$20 sps:$4 sm:$0xff]   ;;  %v930_v45 = vld [vmem:[%s1186_s1 + $0x110] sm:$0xff]   ;;  %v929_v48 = vld [vmem:[%s1187_s0 + $0x58] ss:$20 sps:$4 sm:$0xff]  }
  0x10   :  { %770 = vmatpush3.bf16.msra.mxu0 %v892_v15  ;;  %v924_v43 = vld [vmem:[%s1187_s0 + $0x54] ss:$20 sps:$4 sm:$0xff]   ;;  %v926_v44 = vld [vmem:[%s1187_s0 + $0x5c] ss:$20 sps:$4 sm:$0xff]   ;;  %v933_v50 = vld [vmem:[%s1187_s0 + $0x84] ss:$20 sps:$4 sm:$0xff]  }
  0x11   :  { %810 = vmatpush3.bf16.msra.mxu1 %v893_v16  ;;  %771 = vmatprep.subr.bf16.mxu0 %v894_v17  ;;  %v928_v47 = vld [vmem:[%s1187_s0 + $0x50] ss:$20 sps:$4 sm:$0xff]   ;;  %v112_v53 = vld [vmem:[%s1188_s2 + $0x8] sm:$0xff]  ;;  %v114_v54 = vld [vmem:[%s1188_s2 + $0x18] sm:$0xff] }
  0x12   :  { %811 = vmatprep.subr.bf16.mxu1 %v895_v18  ;;  %v931_v49 = vld [vmem:[%s1187_s0 + $0x7c] ss:$20 sps:$4 sm:$0xff]   ;;  %v111_v51 = vld [vmem:[%s1188_s2] sm:$0xff]  ;;  %v935_v55 = vld [vmem:[%s1187_s0 + $0x78] ss:$20 sps:$4 sm:$0xff]  }
  0x13   :  { %v113_v52 = vld [vmem:[%s1188_s2 + $0x10] sm:$0xff]  ;;  %121 = vperm.xlu0 %876, %v111_v51   ;;  %v115_v58 = vld [vmem:[%s1188_s2 + $0x20] sm:$0xff]  ;;  %v116_v60 = vld [vmem:[%s1188_s2 + $0x28] sm:$0xff] }
  0x14   :  { %772 = vmatpush3.bf16.msra.mxu0 %v896_v19  ;;  %131 = vperm.xlu1 %877, %v113_v52   ;;  %v936_v56 = vld [vmem:[%s1187_s0 + $0x80] ss:$20 sps:$4 sm:$0xff]   ;;  %v938_v57 = vld [vmem:[%s1187_s0 + $0x10] ss:$20 sps:$4 sm:$0xff]   ;;  %v118_v62 = vld [vmem:[%s1188_s2 + $0x38] sm:$0xff] }
  0x15   :  { %812 = vmatpush3.bf16.msra.mxu1 %v897_v20  ;;  %773 = vmatprep.subr.bf16.mxu0 %v898_v21  ;;  %v939_v59 = vld [vmem:[%s1187_s0 + $0x60] ss:$20 sps:$4 sm:$0xff]   ;;  %v940_v63 = vld [vmem:[%s1187_s0 + $0x38] ss:$20 sps:$4 sm:$0xff]   ;;  %v941_v0 = vld [vmem:[%s1187_s0 + $0x88] ss:$20 sps:$4 sm:$0xff]  }
  0x16   :  { %813 = vmatprep.subr.bf16.mxu1 %v899_v22  ;;  %v117_v61 = vld [vmem:[%s1188_s2 + $0x30] sm:$0xff] }
  0x17   :  { %126 = vperm.xlu0 %876, %v112_v53  }
  0x18   :  { %774 = vmatpush3.bf16.msra.mxu0 %v900_v23  ;;  %136 = vperm.xlu1 %877, %v114_v54  }
  0x19   :  { %814 = vmatpush3.bf16.msra.mxu1 %v901_v24  ;;  %775 = vmatprep.subr.bf16.mxu0 %v902_v25 }
  0x1a   :  { %815 = vmatprep.subr.bf16.mxu1 %v903_v26 }
  0x1b   :  { %141 = vperm.xlu0 %876, %v115_v58  }
  0x1c   :  { %776 = vmatpush3.bf16.msra.mxu0 %v904_v27  ;;  %146 = vperm.xlu1 %877, %v116_v60  }
  0x1d   :  { %816 = vmatpush3.bf16.msra.mxu1 %v905_v28  ;;  %777 = vmatprep.subr.bf16.mxu0 %v906_v29 }
  0x1e   :  { %817 = vmatprep.subr.bf16.mxu1 %v907_v30 }
  0x1f   :  { %151 = vperm.xlu0 %876, %v117_v61  }
  0x20   :  { %778 = vmatpush3.bf16.msra.mxu0 %v908_v31  ;;  %156 = vperm.xlu1 %877, %v118_v62  }
  0x21   :  { %818 = vmatpush3.bf16.msra.mxu1 %v909_v32  ;;  %851 = vmatprep.subr.bf16.mxu0 %v916_v37 }
  0x22   :  { %867 = vmatprep.subr.bf16.mxu1 %v916_v37 }
  0x23   :  { %521 = vmatmul.mubr.bf16.vlgmr.msra.gmra.mrb[0].mxu0 %v910_v33 }
  0x24   :  { %586 = vmatmul.mubr.bf16.vlgmr.msra.gmra.mrb[0].mxu1 %v913_v35  ;;  %852 = vmatpush3.bf16.msra.mxu0 %v916_v37 }
  0x25   :  { %871 = vmatpush3.bf16.msra.mxu1 %v916_v37  ;;  %528 = vmatprep.mubr.bf16.mxu0 %v917_v38 }
  0x26   :  { %593 = vmatprep.mubr.bf16.mxu1 %v919_v39  ;;  %853 = vmatprep.subr.bf16.mxu0 %v923_v40 }
  0x27   :  { %868 = vmatprep.subr.bf16.mxu1 %v923_v40 }
  0x28   :  { %854 = vmatpush3.bf16.msra.mxu0 %v923_v40 }
  0x29   :  { %872 = vmatpush3.bf16.msra.mxu1 %v923_v40  ;;  %855 = vmatprep.subr.bf16.mxu0 %v930_v45 }
  0x2a   :  { %869 = vmatprep.subr.bf16.mxu1 %v930_v45 }
  0x2b   :  { %529 = vmatmul.mubr.bf16.gmra.mrb[4].mxu0 %v921_v41 }
  0x2c   :  { %594 = vmatmul.mubr.bf16.gmra.mrb[4].mxu1 %v922_v42  ;;  %536 = vmatprep.mubr.bf16.mxu0 %v924_v43 }
  0x2d   :  { %601 = vmatprep.mubr.bf16.mxu1 %v926_v44  ;;  %856 = vmatpush3.bf16.msra.mxu0 %v930_v45 }
  0x2e   :  { %873 = vmatpush3.bf16.msra.mxu1 %v930_v45  ;;  %857 = vmatprep.subr.bf16.mxu0 %v937_v46 }
  0x2f   :  { %870 = vmatprep.subr.bf16.mxu1 %v937_v46 }
  0x31   :  { %858 = vmatpush3.bf16.msra.mxu0 %v937_v46 }
  0x32   :  { %874 = vmatpush3.bf16.msra.mxu1 %v937_v46 }
  0x33   :  { %537 = vmatmul.mubr.bf16.gmra.mrb[8].mxu0 %v928_v47 }
  0x34   :  { %602 = vmatmul.mubr.bf16.gmra.mrb[8].mxu1 %v929_v48  ;;  %544 = vmatprep.mubr.bf16.mxu0 %v931_v49 }
  0x35   :  { %609 = vmatprep.mubr.bf16.mxu1 %v933_v50 }
  0x3b   :  { %545 = vmatmul.mubr.bf16.gmra.mrb[12].mxu0 %v935_v55 }
  0x3c   :  { %610 = vmatmul.mubr.bf16.gmra.mrb[12].mxu1 %v936_v56  ;;  %859 = vmatprep.mubr.msk.bf16.mxu0 %vm475_vm0, %v938_v57 }
  0x3d   :  { %863 = vmatprep.mubr.msk.bf16.mxu1 %vm475_vm0, %v939_v59 }
  0x43   :  { %860 = vmatmul.mubr.msk.bf16.vlgmr.msra.gmra.mrb[16].mxu0 %vm475_vm0, %v940_v63 }
  0x44   :  { %864 = vmatmul.mubr.msk.bf16.vlgmr.msra.gmra.mrb[16].mxu1 %vm475_vm0, %v941_v0 }
  0x92   :  { %v122_v1 = vpop.permute.xlu0 %121 }
  0x93   :  { %v132_v18 = vpop.permute.xlu1 %131 }
  0x96   :  { %v127_v3 = vpop.permute.xlu0 %126 }
  0x97   :  { %v137_v33 = vpop.permute.xlu1 %136 }
  0x9a   :  { %v142_v36 = vpop.permute.xlu0 %141 }
  0x9b   :  { %v147_v50 = vpop.permute.xlu1 %146 }
  0x9e   :  { %v152_v54 = vpop.permute.xlu0 %151 }
  0xf6   :  { %v779_v2 = vpop.f32.mrb[0].mxu0 }
  0xf7   :  { %v819_v4 = vpop.f32.mrb[0].mxu1  ;;  %v780_v5 = vpop.f32.mrb[1].mxu0 }
  0xf8   :  { %v781_v6 = vadd.f32 %v780_v5, %v779_v2  ;;  %v820_v7 = vpop.f32.mrb[1].mxu1  ;;  %v782_v8 = vpop.f32.mrb[2].mxu0 }
  0xf9   :  { %v821_v9 = vadd.f32 %v820_v7, %v819_v4  ;;  %v822_v10 = vpop.f32.mrb[2].mxu1  ;;  %v783_v11 = vpop.f32.mrb[3].mxu0 }
  0xfa   :  { %v523_v12 = vadd.f32 %v781_v6, %v122_v1  ;;  %v784_v13 = vadd.f32 %v783_v11, %v782_v8  ;;  %v823_v14 = vpop.f32.mrb[3].mxu1  ;;  %v157_v4 = vpop.permute.xlu1 %156 }
  0xfb   :  { %v824_v15 = vadd.f32 %v823_v14, %v822_v10 }
  0xfc   :  { %v526_v16 = vadd.f32 %v784_v13, %v127_v3  ;;  %v588_v17 = vadd.f32 %v821_v9, %v523_v12 }
  0xfe   :  { %v785_v19 = vpop.f32.mrb[4].mxu0  ;;  %v1159_v20 = vadd.f32 %v824_v15, %v526_v16 }
  0xff   :  { %v825_v21 = vpop.f32.mrb[4].mxu1  ;;  %v786_v22 = vpop.f32.mrb[5].mxu0 }
 0x100   :  { %v787_v23 = vadd.f32 %v786_v22, %v785_v19  ;;  %v826_v24 = vpop.f32.mrb[5].mxu1  ;;  %v788_v25 = vpop.f32.mrb[6].mxu0 }
 0x101   :  { %v827_v26 = vadd.f32 %v826_v24, %v825_v21  ;;  %v828_v27 = vpop.f32.mrb[6].mxu1  ;;  %v789_v28 = vpop.f32.mrb[7].mxu0 }
 0x102   :  { %v531_v29 = vadd.f32 %v787_v23, %v132_v18  ;;  %v790_v30 = vadd.f32 %v789_v28, %v788_v25  ;;  %v829_v31 = vpop.f32.mrb[7].mxu1 }
 0x103   :  { %v830_v32 = vadd.f32 %v829_v31, %v828_v27 }
 0x104   :  { %v534_v34 = vadd.f32 %v790_v30, %v137_v33  ;;  %v596_v35 = vadd.f32 %v827_v26, %v531_v29 }
 0x106   :  { %v791_v37 = vpop.f32.mrb[8].mxu0  ;;  %v599_v38 = vadd.f32 %v830_v32, %v534_v34 }
 0x107   :  { %v831_v39 = vpop.f32.mrb[8].mxu1  ;;  %v792_v40 = vpop.f32.mrb[9].mxu0 }
 0x108   :  { %v793_v41 = vadd.f32 %v792_v40, %v791_v37  ;;  %v832_v42 = vpop.f32.mrb[9].mxu1  ;;  %v794_v43 = vpop.f32.mrb[10].mxu0 }
 0x109   :  { %v833_v44 = vadd.f32 %v832_v42, %v831_v39  ;;  %v834_v45 = vpop.f32.mrb[10].mxu1  ;;  %v795_v46 = vpop.f32.mrb[11].mxu0 }
 0x10a   :  { %v539_v47 = vadd.f32 %v793_v41, %v142_v36  ;;  %v796_v48 = vadd.f32 %v795_v46, %v794_v43  ;;  %v835_v49 = vpop.f32.mrb[11].mxu1 }
 0x10b   :  { %v836_v51 = vadd.f32 %v835_v49, %v834_v45 }
 0x10c   :  { %v542_v52 = vadd.f32 %v796_v48, %v147_v50  ;;  %v604_v53 = vadd.f32 %v833_v44, %v539_v47 }
 0x10e   :  { %v797_v55 = vpop.f32.mrb[12].mxu0  ;;  %v607_v56 = vadd.f32 %v836_v51, %v542_v52 }
 0x10f   :  { %v837_v57 = vpop.f32.mrb[12].mxu1  ;;  %v798_v58 = vpop.f32.mrb[13].mxu0 }
 0x110   :  { %v799_v59 = vadd.f32 %v798_v58, %v797_v55  ;;  %v838_v60 = vpop.f32.mrb[13].mxu1  ;;  %v800_v61 = vpop.f32.mrb[14].mxu0 }
 0x111   :  { %v839_v62 = vadd.f32 %v838_v60, %v837_v57  ;;  %v840_v63 = vpop.f32.mrb[14].mxu1  ;;  %v801_v0 = vpop.f32.mrb[15].mxu0 }
 0x112   :  { %v547_v1 = vadd.f32 %v799_v59, %v152_v54  ;;  %v802_v2 = vadd.f32 %v801_v0, %v800_v61  ;;  %v841_v3 = vpop.f32.mrb[15].mxu1 }
 0x113   :  { %v842_v5 = vadd.f32 %v841_v3, %v840_v63 }
 0x114   :  { %v550_v6 = vadd.f32 %v802_v2, %v157_v4  ;;  %v612_v7 = vadd.f32 %v839_v62, %v547_v1 }
 0x116   :  { %v861_v8 = vpop.f32.mrb[16].mxu0  ;;  %v615_v9 = vadd.f32 %v842_v5, %v550_v6 }
 0x117   :  { %v661_v10 = vadd.f32 %v861_v8, %v596_v35  ;;  %v865_v11 = vpop.f32.mrb[16].mxu1  ;;  %v652_v12 = vpop.f32.mrb[17].mxu0 }
 0x118   :  { %v677_v13 = vadd.f32 %v865_v11, %v612_v7  ;;  %v653_v14 = vadd.f32 %v652_v12, %v588_v17  ;;  %v668_v15 = vpop.f32.mrb[17].mxu1  ;;  %v862_v16 = vpop.f32.mrb[18].mxu0 }
 0x119   :  { %v685_v18 = vmax.f32 %v661_v10, 0.0  ;;  %v669_v19 = vadd.f32 %v668_v15, %v604_v53  ;;  %v664_v21 = vadd.f32 %v862_v16, %v599_v38  ;;  %v866_v22 = vpop.f32.mrb[18].mxu1  ;;  %v655_v23 = vpop.f32.mrb[19].mxu0 }
 0x11a   :  { %v689_v24 = vmax.f32 %v677_v13, 0.0  ;;  %v683_v25 = vmax.f32 %v653_v14, 0.0  ;;  %v680_v26 = vadd.f32 %v866_v22, %v615_v9  ;;  %v656_v27 = vadd.f32 %v655_v23, %v1159_v20  ;;  %v671_v28 = vpop.f32.mrb[19].mxu1 }
 0x11b   :  { %693 = vst [vmem:[%s1189_s3 + $0x10] sm:$0xff] %v685_v18  ;;  %v687_v29 = vmax.f32 %v669_v19, 0.0  ;;  %v686_v30 = vmax.f32 %v664_v21, 0.0  ;;  %v672_v17 = vadd.f32 %v671_v28, %v607_v56 }
 0x11c   :  { %697 = vst [vmem:[%s1189_s3 + $0x30] sm:$0xff] %v689_v24  ;;  %691 = vst [vmem:[%s1189_s3] sm:$0xff] %v683_v25  ;;  %v690_v31 = vmax.f32 %v680_v26, 0.0  ;;  %v684_v32 = vmax.f32 %v656_v27, 0.0 }
 0x11d   :  { %695 = vst [vmem:[%s1189_s3 + $0x20] sm:$0xff] %v687_v29  ;;  %694 = vst [vmem:[%s1189_s3 + $0x18] sm:$0xff] %v686_v30  ;;  %v688_v20 = vmax.f32 %v672_v17, 0.0 }
 0x11e   :  { %698 = vst [vmem:[%s1189_s3 + $0x38] sm:$0xff] %v690_v31  ;;  %692 = vst [vmem:[%s1189_s3 + $0x8] sm:$0xff] %v684_v32 }
 0x11f   :  { %696 = vst [vmem:[%s1189_s3 + $0x28] sm:$0xff] %v688_v20 }

</bundles_post_ra>
